<compile_context>
chip_gen: v7x
topology: tpu7x:2x2x1
jax: 0.10.0
libtpu: 0.0.40
codegen_flags: <defaults>
</compile_context>

<pallas_src>
import functools

import jax
import jax.numpy as jnp
from jax.experimental import pallas as pl
from jax.experimental.pallas import tpu as pltpu


def _rmsnorm_kernel(w_ref, x_ref, o_ref, *, eps):
    # x_ref: (block_rows, H) in the input dtype; w_ref: (1, H) in f32 (resident,
    # constant block index). All math in f32, one downcast at the store.
    x = x_ref[...].astype(jnp.float32)
    var = jnp.mean(x * x, axis=-1, keepdims=True)   # cross-lane reduce -> XLU
    y = x * jax.lax.rsqrt(var + eps)                # rsqrt -> EUP
    o_ref[...] = (w_ref[...] * y).astype(o_ref.dtype)


def _sublane_pack(dtype):
    # rows per vreg sublane group: 8 for 4-byte, 16 for 2-byte, 32 for 1-byte dtypes.
    return max(8, 32 // jnp.dtype(dtype).itemsize)


def rmsnorms_with_masks(hidden_states, rms_weights, mask_values, eps=1e-6,
                        block_rows=None):
    """Pallas equivalent of RMSNormsWithMasks.forward with scalar masks."""
    # Glue: merge the masked weights (sum over layers of scalar * weight).
    # Keep the merged weight in f32 so no weight precision is lost before the kernel.
    merged_weight = sum(v * w for v, w in zip(mask_values, rms_weights))
    merged_weight = merged_weight.astype(jnp.float32)

    orig_shape = hidden_states.shape
    H = orig_shape[-1]
    dtype = hidden_states.dtype
    itemsize = jnp.dtype(dtype).itemsize
    sublane = _sublane_pack(dtype)

    x2d = hidden_states.reshape(-1, H)
    R = x2d.shape[0]

    # ---- choose block_rows (rows per grid step) ---------------------------------
    if block_rows is None:
        # Budget ~48 MiB of VMEM: 2 buffers x (input tile + output tile) plus
        # headroom for the f32 intermediates -> ~6 tile-equivalents.
        vmem_budget = 48 << 20
        bytes_per_row = H * itemsize
        max_rows = max(sublane, vmem_budget // max(1, bytes_per_row * 6))
        block_rows = min(1024, max_rows)
    # Align to the sublane packing factor (keeps loads/stores unmasked).
    block_rows = max(sublane, (block_rows // sublane) * sublane)
    # Keep the grid >= 2 steps when there's enough data (feeds both TCs on v7x).
    if R >= 2 * sublane:
        half = -(-((R + 1) // 2) // sublane) * sublane
        block_rows = min(block_rows, half)
    # Never exceed the (sublane-padded) row count.
    block_rows = min(block_rows, -(-R // sublane) * sublane)

    # ---- pad rows so the grid covers R exactly (no divisibility assert) ---------
    num_blocks = pl.cdiv(R, block_rows)
    R_pad = num_blocks * block_rows
    if R_pad != R:
        x2d = jnp.pad(x2d, ((0, R_pad - R), (0, 0)))

    # ---- explicit VMEM limit: 2x(in tile) + 2x(out tile) + weight + headroom ----
    tile_bytes = block_rows * H * itemsize
    vmem_limit = int(min(56 << 20, 4 * tile_bytes + H * 4 + (4 << 20)))

    # TODO(synk): if H < 128 in production, fold rows into the lane dim so the
    # output last dim is a multiple of 128 (avoids masked vst.msk partial stores).

    out2d = pl.pallas_call(
        functools.partial(_rmsnorm_kernel, eps=eps),
        out_shape=jax.ShapeDtypeStruct((R_pad, H), dtype),
        grid_spec=pltpu.PrefetchScalarGridSpec(
            num_scalar_prefetch=0,
            grid=(num_blocks,),
            in_specs=[
                pl.BlockSpec((1, H), lambda i: (0, 0)),            # merged weight (resident)
                pl.BlockSpec((block_rows, H), lambda i: (i, 0)),   # x rows
            ],
            out_specs=pl.BlockSpec((block_rows, H), lambda i: (i, 0)),
        ),
        compiler_params=pltpu.CompilerParams(
            dimension_semantics=("parallel",),
            vmem_limit_bytes=vmem_limit),
    )(merged_weight.reshape(1, H), x2d)

    if R_pad != R:
        out2d = out2d[:R]
    return out2d.reshape(orig_shape)


def _reference(hidden_states, rms_weights, mask_values, eps=1e-6):
    # Torch-ordering reference: merged_weight * hidden_states.to(input_dtype)
    merged_weight = sum(v * w for v, w in zip(mask_values, rms_weights))
    x = hidden_states.astype(jnp.float32)
    var = jnp.mean(x * x, axis=-1, keepdims=True)
    y = x * jax.lax.rsqrt(var + eps)
    return merged_weight * y.astype(hidden_states.dtype)


if __name__ == "__main__":
    B, S, H = 2, 8, 32
    key = jax.random.PRNGKey(0)
    kx, kw0, kw1 = jax.random.split(key, 3)

    hidden_states = jax.random.normal(kx, (B, S, H), dtype=jnp.float32)

    # Two "RMSNorm" layers' weights (shape (H,)), deterministically initialized.
    rms_weights = [
        1.0 + 0.1 * jax.random.normal(kw0, (H,), dtype=jnp.float32),
        1.0 + 0.1 * jax.random.normal(kw1, (H,), dtype=jnp.float32),
    ]
    # Scalar masks (mode='scalar' — the only mode RMSNormWithMask accepts).
    mask_values = [0.5, 1.5]
    eps = 1e-6

    out = rmsnorms_with_masks(hidden_states, rms_weights, mask_values, eps=eps)
    out = jax.block_until_ready(out)

    ref = _reference(hidden_states, rms_weights, mask_values, eps=eps)
    assert out.shape == hidden_states.shape
    assert jnp.allclose(out, ref, atol=1e-5, rtol=1e-5), "mismatch vs reference"

    # Also exercise the ragged-tail / padding path (R not divisible by block_rows).
    hs_ragged = jax.random.normal(kx, (3, 5, H), dtype=jnp.float32)
    out_r = jax.block_until_ready(
        rmsnorms_with_masks(hs_ragged, rms_weights, mask_values, eps=eps))
    ref_r = _reference(hs_ragged, rms_weights, mask_values, eps=eps)
    assert jnp.allclose(out_r, ref_r, atol=1e-5, rtol=1e-5), "ragged mismatch"

    print("KERNEL_OK")
</pallas_src>

<mosaic_0001>
module attributes {stable_mosaic.version = 11 : i64} {
  func.func @_rmsnorm_kernel(%arg0: i32, %arg1: memref<1x32xf32, #tpu.memory_space<vmem>>, %arg2: memref<8x32xf32, #tpu.memory_space<vmem>>, %arg3: memref<8x32xf32, #tpu.memory_space<vmem>>) attributes {dimension_semantics = [#tpu.dimension_semantics<parallel>], iteration_bounds = array<i64: 2>, scalar_prefetch = 0 : i64, scratch_operands = 0 : i64, tpu.core_type = #tpu.core_type<tc>, window_params = [{pipeline_mode = #tpu.pipeline_mode<synchronous>, transform_indices = @transform_0, window_bounds = array<i64: 1, 32>}, {transform_indices = @transform_1, window_bounds = array<i64: 8, 32>}, {transform_indices = @transform_2, window_bounds = array<i64: 8, 32>}]} {
    %c0 = arith.constant 0 : index
    %c0_0 = arith.constant 0 : index
    %0 = vector.load %arg2[%c0, %c0_0] : memref<8x32xf32, #tpu.memory_space<vmem>>, vector<8x32xf32>
    %1 = arith.mulf %0, %0 : vector<8x32xf32>
    %cst = arith.constant dense<0.000000e+00> : vector<8xf32>
    %2 = vector.multi_reduction <add>, %1, %cst [1] : vector<8x32xf32> to vector<8xf32>
    %3 = vector.shape_cast %2 : vector<8xf32> to vector<8x1xf32>
    %cst_1 = arith.constant 3.200000e+01 : f32
    %4 = vector.broadcast %cst_1 : f32 to vector<8x1xf32>
    %5 = arith.divf %3, %4 : vector<8x1xf32>
    %cst_2 = arith.constant 9.99999997E-7 : f32
    %6 = vector.broadcast %cst_2 : f32 to vector<8x1xf32>
    %7 = arith.addf %5, %6 : vector<8x1xf32>
    %8 = math.rsqrt %7 : vector<8x1xf32>
    %9 = vector.broadcast %8 : vector<8x1xf32> to vector<8x32xf32>
    %10 = arith.mulf %0, %9 : vector<8x32xf32>
    %c0_3 = arith.constant 0 : index
    %c0_4 = arith.constant 0 : index
    %11 = vector.load %arg1[%c0_3, %c0_4] : memref<1x32xf32, #tpu.memory_space<vmem>>, vector<1x32xf32>
    %12 = vector.broadcast %11 : vector<1x32xf32> to vector<8x32xf32>
    %13 = arith.mulf %12, %10 : vector<8x32xf32>
    %c0_5 = arith.constant 0 : index
    %c0_6 = arith.constant 0 : index
    %14 = vector.load %arg3[%c0_5, %c0_6] : memref<8x32xf32, #tpu.memory_space<vmem>>, vector<8x32xf32>
    tpu.vector_store %arg3[%c0_5, %c0_6], %13 {strides = array<i32>} : memref<8x32xf32, #tpu.memory_space<vmem>>, vector<8x32xf32>,
    return
  }
  func.func @transform_0(%arg0: i32) -> (i32, i32) {
    %c0_i32 = arith.constant 0 : i32
    %c0_i32_0 = arith.constant 0 : i32
    %c0_i32_1 = arith.constant 0 : i32
    return %c0_i32, %c0_i32_0 : i32, i32
  }
  func.func @transform_1(%arg0: i32) -> (i32, i32) {
    %c0_i32 = arith.constant 0 : i32
    %c0_i32_0 = arith.constant 0 : i32
    return %arg0, %c0_i32 : i32, i32
  }
  func.func @transform_2(%arg0: i32) -> (i32, i32) {
    %c0_i32 = arith.constant 0 : i32
    %c0_i32_0 = arith.constant 0 : i32
    return %arg0, %c0_i32 : i32, i32
  }
}

</mosaic_0001>

<bundles_post_ra>
// kernel: tpu_custom_call.1
= control target key start
LH: loop header
LB: loop body
LE: loop exit
PB: predicated region body
PF: predicated region fallthrough
CT: control target
= control target key end

     0   :  { %7 = vsyncpa [#allocation3], 0  ;;  %s713_s0 = inlined_call_operand.hbm [shape: f32[1,32], index: 0, kind: input, shape index: {}]   ;;  %s714_s1 = inlined_call_operand.hbm [shape: f32[16,32], index: 1, kind: input, shape index: {}]   ;;  %s715_s2 = inlined_call_operand.hbm [shape: f32[16,32], index: 2, kind: output, shape index: {}]  }
   0x1   :  { %8 = vsyncpa [#allocation6], 0 }
   0x2   :  { %10 = vsyncpa [#allocation6 + $0x1], 0 }
   0x3   :  { %11 = vsyncpa [#allocation4], 0 }
   0x4   :  { %13 = vsyncpa [#allocation4 + $0x1], 0  ;;  %s510_s9 = smov 0   ;;  %s512_s10 = smov 0  }
   0x5   :  { %s514_s11 = smov 0   ;;  %s516_s12 = smov 0  }
   0x6 LB: > { %s531_s13 = sadd.s32 4294967295, %s490_s12   ;;  %s288_s14 = sadd.s32 4294967294, %s490_s12   ;;  %s490_s12 = sphi %s516_s12, %s739_s12   ;;  %s486_s11 = sphi %s514_s11, %s738_s11   ;;  %s482_s10 = sphi %s512_s10, %s737_s10   ;;  %s478_s9 = sphi %s510_s9, %s736_s9  }
   0x7   : > { %p60_p0 = scmp.ne.s32.totalorder %s482_s10, %s478_s9  ;;  %p716_p1 = scmp.eq.s32.totalorder %s531_s13, 0 }
   0x8   : > { %p90_p3 = scmp.eq.s32.totalorder %s288_s14, 1  ;;  %p289_p5 = scmp.ge.s32.totalorder %s490_s12, 1 }
   0x9   : > { %p540_p4 = por %p716_p1, %p60_p0  ;;  %p97_p7 = scmp.lt.s32.totalorder %s490_s12, 3 }
   0xa   : > { %p545_p6 = por %p90_p3, %p60_p0  ;;  %s492_s18 = smov [#allocation2]  }
   0xb   : > { %s719_s15 = scalar_select %p540_p4, 1, 0 }
   0xc   : > { %s720_s16 = scalar_select %p545_p6, 1, 0 }
   0xd   : > { %p550_p8 = pnand %p289_p5, %p97_p7  ;;  %s110_s19 = sshll.u32 %s492_s18, 4  ;;  %s111_s19 = int_to_ptr.vmem [resolvable:$true] %s110_s19 }
   0xe   : > { %s558_s20 = sadd.s32 1, %s490_s12   ;;  %s47_s24 = sadd.s32 1, %s486_s11 }
   0xf   : > { %s721_s17 = scalar_select %p550_p8, 1, 0 }
  0x10   : > { %p311_p10 = pneg %p550_p8  ;;  %s44_s22 = ssub.s32 %s490_s12, %s558_s20 }
  0x11   : > { %p568_p12 = scmp.eq.s32.totalorder %s44_s22, 0  ;;  %s362_s27 = scalar_lea.hbm %s713_s0, 16 }
  0x12   : > { %p562_p11 = pnand %p311_p10, %p716_p1  ;;  %p363_p0 = scmp.ne.s32.totalorder %s713_s0, %s362_s27 }
  0x13   : > { %s723_s23 = scalar_select %p568_p12, 1, 0 }
  0x14   : > { %p364_p3 = pneg %p562_p11  ;;  %p369_p10 = scmp.lt.u32.totalorder %s362_s27, %s713_s0 }
  0x16   : > { %p365_p5 = pnand %p364_p3, %p363_p0 }
  0x18   : > { %p366_p7 = pneg %p365_p5 }
  0x1a   : > { %p371_p9 = pnand %p369_p10, %p366_p7 }
  0x1c   : > { %374 = shalt.err (!%p371_p9)
}
  0x1d   : > { %s375_s4 = scalar_lea.vmem %s111_s19, 16  ;;  %s382_s5 = scalar_lea.vmem %s111_s19, 32 }
  0x1e   : > { %p376_p1 = scmp.ne.s32.totalorder %s111_s19, %s375_s4  ;;  %p383_p6 = scmp.lt.s32.totalorder %s111_s19, %s111_s19 }
  0x1f   : > { %p384_p4 = scmp.lt.s32.totalorder %s382_s5, %s375_s4 }
  0x20   : > { %p378_p2 = pnand %p376_p1, %p364_p3 }
  0x21   : > { %p385_p8 = por %p384_p4, %p383_p6 }
  0x22   : > { %p379_p13 = pneg %p378_p2 }
  0x24   : > { %p386_p12 = pnand %p385_p8, %p379_p13 }
  0x26   : > { %389 = shalt.err (!%p386_p12)
}
  0x27   : > { %314 = dma.hbm_to_vmem [thread:$0]  (!%p562_p11), %s713_s0, 16, %s111_s19, [#allocation3]  }
  0x28   : > { %p724_p1 = scmp.ne.s32.totalorder %s723_s23, 0  ;;  %p55_p2 = scmp.eq.s32.totalorder %s490_s12, 0 }
  0x29   : > { %p725_p4 = scmp.ne.s32.totalorder %s486_s11, %s482_s10  ;;  %p726_p6 = scmp.eq.s32.totalorder %s531_s13, 1 }
  0x2a   : > { %s594_s8 = scalar_select %p724_p1, %s486_s11, %s47_s24  }
  0x2b   : > { %p602_p8 = por %p726_p6, %p725_p4  ;;  %p324_p9 = scmp.lt.s32.totalorder %s490_s12, 2 }
  0x2c   : > { %s121_s18 = sand.u32 1, %s486_s11   ;;  %p728_p12 = pmov %p725_p4 }
  0x2d   : > { %s292_s21 = sshll.u32 %s121_s18, 3  ;;  %s293_s22 = sshll.u32 %s490_s12, 7 }
  0x2e   : > { %p56_p13 = por %p55_p2, %p728_p12  ;;  %s615_s19 = scalar_lea.hbm %s714_s1, %s293_s22 }
  0x2f   : > { %s125_s23 = scalar_lea.vmem [#allocation5], %s292_s21  ;;  %s122_s28 = scalar_lea.sflag [#allocation6], %s121_s18 }
  0x30   : > { %s132_s24 = sshll.u32 %s125_s23, 4  ;;  %p617_p11 = pnand %p324_p9, %p56_p13  ;;  %s621_s24 = int_to_ptr.vmem [resolvable:$true] %s132_s24 }
  0x31   : > { %s390_s29 = scalar_lea.hbm %s615_s19, 128  ;;  %s395_s4 = scalar_lea.hbm %s714_s1, 256 }
  0x32   : > { %p391_p0 = scmp.ne.s32.totalorder %s615_s19, %s390_s29  ;;  %p392_p3 = pneg %p617_p11 }
  0x33   : > { %p396_p10 = scmp.lt.u32.totalorder %s615_s19, %s714_s1  ;;  %p397_p1 = scmp.lt.u32.totalorder %s395_s4, %s390_s29 }
  0x34   : > { %p393_p5 = pnand %p392_p3, %p391_p0  ;;  %p399_p4 = scmp.lt.u32.totalorder %s390_s29, %s615_s19 }
  0x35   : > { %p398_p2 = por %p397_p1, %p396_p10 }
  0x36   : > { %p394_p7 = pneg %p393_p5 }
  0x37   : > { %p400_p6 = por %p399_p4, %p398_p2 }
  0x39   : > { %p401_p9 = pnand %p400_p6, %p394_p7 }
  0x3b   : > { %404 = shalt.err (!%p401_p9)
}
  0x3c   : > { %s405_s7 = scalar_lea.vmem %s621_s24, 128  ;;  %s493_s18 = smov [#allocation5]  }
  0x3d   : > { %p406_p12 = scmp.ne.s32.totalorder %s621_s24, %s405_s7  ;;  %s410_s21 = sshll.u32 %s493_s18, 4  ;;  %s411_s21 = int_to_ptr.vmem [resolvable:$false] %s410_s21 }
  0x3e   : > { %s412_s22 = scalar_lea.vmem %s411_s21, 256  ;;  %p413_p5 = scmp.lt.s32.totalorder %s621_s24, %s411_s21 }
  0x3f   : > { %p408_p13 = pnand %p406_p12, %p392_p3  ;;  %p414_p10 = scmp.lt.s32.totalorder %s412_s22, %s405_s7 }
  0x41   : > { %p409_p0 = pneg %p408_p13  ;;  %p415_p1 = por %p414_p10, %p413_p5 }
  0x43   : > { %p416_p2 = pnand %p415_p1, %p409_p0 }
  0x45   : > { %419 = shalt.err (!%p416_p2)
}
  0x46   : > { %318 = dma.hbm_to_vmem [thread:$0]  (!%p617_p11), %s615_s19, 128, %s621_s24, %s122_s28  }
  0x47   : > { %p730_p7 = scmp.ne.s32.totalorder %s721_s17, 0 }
  0x48   : > { %p731_p3 = scmp.eq.s32.totalorder (!%p730_p7), %s531_s13, 0 }
  0x49   : > { %141 = sbr.rel (%p730_p7) target bundleno = 264 (0x108), region = 28 }
  0x50   : > { %465 = dma.done.wait (%p731_p3), [#allocation3], 16   ;;  %p732_p4 = pmov %p731_p3 }
  0x51   : > { %s655_s25 = sand.u32 1, %s482_s10   ;;  %p733_p6 = scmp.ne.s32.totalorder %s719_s15, 0 }
  0x52   : > { %467 = vsyncadd (%p732_p4), [#allocation3], 4294967280  ;;  %s296_s26 = sshll.u32 %s655_s25, 3  ;;  %s148_s23 = scalar_lea.sflag [#allocation6], %s655_s25 }
  0x53   : > { %s151_s27 = scalar_lea.vmem [#allocation5], %s296_s26 }
  0x54   : > { %469 = dma.done.wait (%p733_p6), %s148_s23, 128  }
  0x55   : > { %471 = vsyncadd (%p733_p6), %s148_s23, 4294967168  ;;  %v172_v0 = vld [vmem:[%s151_s27] sm:$0xff]  ;;  %vm174_vm0 = vcmask 261120   ;;  %v298_v7 = vld [vmem:[#allocation2] ss:$0 sm:$0xff]  ;;  %s300_s17 = sshll.u32 %s531_s13, 7 }
  0x56   : > { %v173_v1 = vmul.f32 %v172_v0, %v172_v0  ;;  %s171_s19 = scalar_lea.vmem [#allocation7], %s296_s26  ;;  %s668_s29 = scalar_lea.hbm %s715_s2, %s300_s17 }
  0x57   : > { %s206_s24 = sshll.u32 %s171_s19, 4  ;;  %s193_s30 = scalar_lea.sflag [#allocation4], %s655_s25  ;;  %s670_s24 = int_to_ptr.vmem [resolvable:$true] %s206_s24 }
  0x58   : > { %v175_v2 = vsel %vm174_vm0, %v173_v1, 0.0  ;;  %s420_s3 = scalar_lea.vmem %s670_s24, 128  ;;  %s494_s13 = smov [#allocation7]  }
  0x59   : > { %176 = vadd.xlane.f32.xlu0 %v175_v2  ;;  %p421_p11 = scmp.ne.s32.totalorder %s670_s24, %s420_s3  ;;  %s424_s4 = sshll.u32 %s494_s13, 4  ;;  %s425_s4 = int_to_ptr.vmem [resolvable:$false] %s424_s4 }
  0x5a   : > { %s426_s5 = scalar_lea.vmem %s425_s4, 256  ;;  %p427_p13 = scmp.lt.s32.totalorder %s670_s24, %s425_s4 }
  0x5b   : > { %p422_p9 = pnand %p421_p11, %p602_p8  ;;  %p428_p0 = scmp.lt.s32.totalorder %s426_s5, %s420_s3 }
  0x5d   : > { %p423_p12 = pneg %p422_p9  ;;  %p429_p5 = por %p428_p0, %p427_p13 }
  0x5f   : > { %p430_p10 = pnand %p429_p5, %p423_p12 }
  0xe6   : > { %v177_v3 = vpop.xlane.xlu0 %176 }
  0xe7   : > { %v179_v4 = vmul.f32 0.03125, %v177_v3 }
  0xe9   : > { %v180_v5 = vadd.f32 1e-06, %v179_v4 }
  0xeb   : > { %360 = vrsqrt.f32 %v180_v5 }
  0xf5   : > { %v361_v6 = vpop.eup %360 }
  0xf6   : > { %v182_v8 = vmul.f32 %v361_v6, %v172_v0 }
  0xf8   : > { %v190_v9 = vmul.f32 %v298_v7, %v182_v8 }
  0xfa   : > { %191 = vst.msk [vmem:[%s171_s19] sm:$0xff] %vm174_vm0, %v190_v9 }
  0xfb   : > { %433 = shalt.err (!%p430_p10)
}
  0xfc   : > { %s434_s6 = scalar_lea.hbm %s668_s29, 128  ;;  %s438_s21 = scalar_lea.hbm %s715_s2, 256 }
  0xfd   : > { %p435_p1 = scmp.ne.s32.totalorder %s668_s29, %s434_s6  ;;  %p439_p3 = scmp.lt.u32.totalorder %s668_s29, %s715_s2 }
  0xfe   : > { %p440_p4 = scmp.lt.u32.totalorder %s438_s21, %s434_s6  ;;  %p442_p11 = scmp.lt.u32.totalorder %s434_s6, %s668_s29 }
  0xff   : > { %p436_p2 = pnand %p435_p1, %p602_p8 }
 0x100   : > { %p441_p6 = por %p440_p4, %p439_p3 }
 0x101   : > { %p437_p7 = pneg %p436_p2 }
 0x102   : > { %p443_p9 = por %p442_p11, %p441_p6 }
 0x104   : > { %p444_p12 = pnand %p443_p9, %p437_p7 }
 0x106   : > { %447 = shalt.err (!%p444_p12)
}
 0x107   : > { %309 = dma.vmem_to_hbm [thread:$0]  (%p602_p8), %s670_s24, 128, %s668_s29, %s193_s30  }
 0x108 PF: > { %s218_s26 = sand.u32 1, %s478_s9   ;;  %p734_p13 = scmp.ne.s32.totalorder %s720_s16, 0 }
 0x109   : > { %p735_p0 = scmp.ge.s32.totalorder %s490_s12, 2  ;;  %s219_s23 = scalar_lea.sflag [#allocation4], %s218_s26 }
 0x10b   : > { %p320_p5 = pnand %p735_p0, %p734_p13 }
 0x10d   : > { %473 = dma.done.wait (!%p320_p5), %s219_s23, 128  }
 0x10e   : > { %475 = vsyncadd (!%p320_p5), %s219_s23, 4294967168  ;;  %p16_p10 = scmp.ge.s32.totalorder %s558_s20, 4   ;;  %s736_s9 = smov %s482_s10 }
 0x10f   : > { %s737_s10 = smov %s486_s11  ;;  %s738_s11 = smov %s594_s8 }
 0x110   : > { %s739_s12 = smov %s558_s20  ;;  %18 = sbr.rel (!%p16_p10) target bundleno = 6 (0x6), region = 78 }
 0x117   :  { %224 = vsyncpa [#allocation3], 1 }
 0x118   :  { %226 = vsyncpa [#allocation3 + $0x1], 1 }
 0x119   :  { %227 = vsyncpa [#allocation6], 1 }
 0x11a   :  { %229 = vsyncpa [#allocation6 + $0x1], 1 }
 0x11b   :  { %230 = vsyncpa [#allocation4], 1 }
 0x11c   :  { %232 = vsyncpa [#allocation4 + $0x1], 1 }

</bundles_post_ra>
